<compile_context>
chip_gen: v7x
topology: tpu7x:2x2x1
jax: 0.10.0
libtpu: 0.0.40
codegen_flags: <defaults>
</compile_context>

<pallas_src>
import functools

import jax
import jax.numpy as jnp
from jax.experimental import pallas as pl
from jax.experimental.pallas import tpu as pltpu


def _molecule_pooling_kernel(mask_ref, node_ref, w_ref, gamma_ref, beta_ref,
                             out_ref, acc_ref, *, eps):
    """Grid: (N // tn,) over the atom axis (reduction, 'arbitrary').

    mask_ref  : (B, N)        full, resident (tiny)
    node_ref  : (B, tn, nin)  per-step tile, channels-last (lane-dense)
    w_ref     : (nin, nout)   full, resident (1x1 conv weight, pre-transposed)
    gamma_ref : (1, nout)     BatchNorm affine scale
    beta_ref  : (1, nout)     BatchNorm affine shift
    out_ref   : (B, nout)     written once in the finalize step
    acc_ref   : (B, nin) f32 scratch -- running sum over atoms
    """
    step = pl.program_id(0)

    @pl.when(step == 0)
    def _init():
        acc_ref[...] = jnp.zeros_like(acc_ref)

    # Accumulate the atom-sum for this tile; upcast after the DMA (no wrapper casts).
    acc_ref[...] += jnp.sum(node_ref[...].astype(jnp.float32), axis=1)

    @pl.when(step == pl.num_programs(0) - 1)
    def _finalize():
        # Number of atoms per molecule, (B, 1).  (Matches torch: node itself is NOT
        # masked before the sum; the mask only provides the divisor.)
        n_atoms = jnp.sum(mask_ref[...].astype(jnp.float32), axis=1, keepdims=True)
        pooled = acc_ref[...] / n_atoms                                    # (B, nin)

        # 1x1 Conv1d (bias=False) on a length-1 sequence == matmul on the MXU.
        y = jnp.dot(pooled, w_ref[...].astype(jnp.float32),
                    preferred_element_type=jnp.float32)                    # (B, nout)

        # BatchNorm1d with training-mode batch statistics (what a freshly constructed
        # PyTorch module computes), biased variance, then affine + ReLU.
        mean = jnp.mean(y, axis=0, keepdims=True)
        var = jnp.mean((y - mean) ** 2, axis=0, keepdims=True)
        y = (y - mean) * jax.lax.rsqrt(var + eps)
        y = y * gamma_ref[...].astype(jnp.float32) + beta_ref[...].astype(jnp.float32)
        out_ref[...] = jnp.maximum(y, 0.0).astype(out_ref.dtype)
        # TODO(synk): BatchNorm1d running_mean/running_var buffer updates (training
        # side effect) are not emitted; only the forward output is computed.


def molecule_pooling(node_mask, node, weight, gamma, beta, *, eps=1e-5, atom_tile=8):
    """Pallas implementation of MoleculePooling.forward.

    node_mask : (B, N, 1) or (B, N)   binary atom mask
    node      : (B, nin, N)           PyTorch Conv1d layout (channels first)
    weight    : (nout, nin, 1) or (nout, nin)  Conv1d(nin, nout, 1, bias=False).weight
    gamma, beta : (nout,)             BatchNorm1d affine parameters
    returns   : (B, nout, 1)
    """
    B, nin, N = node.shape
    nout = weight.shape[0]

    # Layout plumbing only (no dtype casts here): channels-last for lane density.
    mask2 = node_mask.reshape(B, N)
    node_cl = jnp.swapaxes(node, 1, 2)                      # (B, N, nin)
    w_t = jnp.swapaxes(weight.reshape(nout, nin), 0, 1)     # (nin, nout)
    gamma2 = gamma.reshape(1, nout)
    beta2 = beta.reshape(1, nout)

    # Atom-axis tile: must be a multiple of 8 (sublane) or equal to N.
    if N % atom_tile == 0 and atom_tile % 8 == 0:
        tn = atom_tile
    else:
        tn = N  # single-step fallback: block == full array is always legal
    grid = (N // tn,)

    out = pl.pallas_call(
        functools.partial(_molecule_pooling_kernel, eps=eps),
        out_shape=jax.ShapeDtypeStruct((B, nout), node.dtype),
        grid_spec=pltpu.PrefetchScalarGridSpec(
            num_scalar_prefetch=0,
            grid=grid,
            in_specs=[
                pl.BlockSpec((B, N), lambda n: (0, 0)),          # mask (resident)
                pl.BlockSpec((B, tn, nin), lambda n: (0, n, 0)),  # node tile (pipelined)
                pl.BlockSpec((nin, nout), lambda n: (0, 0)),     # weight (resident)
                pl.BlockSpec((1, nout), lambda n: (0, 0)),       # gamma
                pl.BlockSpec((1, nout), lambda n: (0, 0)),       # beta
            ],
            out_specs=pl.BlockSpec((B, nout), lambda n: (0, 0)),
            scratch_shapes=[pltpu.VMEM((B, nin), jnp.float32)],
        ),
        compiler_params=pltpu.CompilerParams(
            dimension_semantics=("arbitrary",),   # atom axis is a reduction
        ),
    )(mask2, node_cl, w_t, gamma2, beta2)

    return out.reshape(B, nout, 1)


def molecule_pooling_ref(node_mask, node, weight, gamma, beta, eps=1e-5):
    """Pure-JAX reference mirroring the PyTorch forward (training-mode BatchNorm)."""
    B, nin, N = node.shape
    nout = weight.shape[0]
    node = node.astype(jnp.float32)
    n_atoms = node_mask.reshape(B, N).astype(jnp.float32).sum(axis=1, keepdims=True)
    pooled = node.sum(-1) / n_atoms                                   # (B, nin)
    y = pooled @ weight.reshape(nout, nin).astype(jnp.float32).T      # (B, nout)
    mean = y.mean(axis=0, keepdims=True)
    var = ((y - mean) ** 2).mean(axis=0, keepdims=True)
    y = (y - mean) / jnp.sqrt(var + eps)
    y = y * gamma.reshape(1, nout) + beta.reshape(1, nout)
    return jnp.maximum(y, 0.0).reshape(B, nout, 1)


if __name__ == "__main__":
    B, N, NIN, NOUT = 8, 32, 128, 128   # batch, atoms, in-features, out-features
    key = jax.random.PRNGKey(0)
    k1, k2, k3, k4, k5 = jax.random.split(key, 5)

    # Node features in PyTorch Conv1d layout (B, nin, N).
    node = jax.random.normal(k1, (B, NIN, N), dtype=jnp.float32)

    # Binary atom mask (B, N, 1): first n_valid[b] atoms are real.
    n_valid = jax.random.randint(k2, (B, 1), N // 2, N + 1)
    mask = (jnp.arange(N)[None, :] < n_valid).astype(jnp.float32)[..., None]

    # Conv1d(nin, nout, 1, bias=False) weight + BatchNorm1d affine params.
    weight = jax.random.normal(k3, (NOUT, NIN, 1), dtype=jnp.float32) / jnp.sqrt(NIN)
    gamma = 0.5 + jax.random.uniform(k4, (NOUT,), dtype=jnp.float32)
    beta = 0.1 * jax.random.normal(k5, (NOUT,), dtype=jnp.float32)

    result = molecule_pooling(mask, node, weight, gamma, beta, atom_tile=8)
    result = jax.block_until_ready(result)

    ref = jax.block_until_ready(molecule_pooling_ref(mask, node, weight, gamma, beta))
    assert result.shape == (B, NOUT, 1), result.shape
    assert jnp.allclose(result, ref, atol=1e-3, rtol=1e-3), (
        float(jnp.max(jnp.abs(result - ref))))

    print("KERNEL_OK")
</pallas_src>

<mosaic_0001>
module attributes {stable_mosaic.version = 11 : i64} {
  func.func @_molecule_pooling_kernel(%arg0: i32, %arg1: memref<8x32xf32, #tpu.memory_space<vmem>>, %arg2: memref<8x8x128xf32, #tpu.memory_space<vmem>>, %arg3: memref<128x128xf32, #tpu.memory_space<vmem>>, %arg4: memref<1x128xf32, #tpu.memory_space<vmem>>, %arg5: memref<1x128xf32, #tpu.memory_space<vmem>>, %arg6: memref<8x128xf32, #tpu.memory_space<vmem>>, %arg7: memref<8x128xf32, #tpu.memory_space<vmem>>) attributes {dimension_semantics = [#tpu.dimension_semantics<arbitrary>], iteration_bounds = array<i64: 4>, scalar_prefetch = 0 : i64, scratch_operands = 1 : i64, tpu.core_type = #tpu.core_type<tc>, window_params = [{pipeline_mode = #tpu.pipeline_mode<synchronous>, transform_indices = @transform_0, window_bounds = array<i64: 8, 32>}, {transform_indices = @transform_1, window_bounds = array<i64: 8, 8, 128>}, {pipeline_mode = #tpu.pipeline_mode<synchronous>, transform_indices = @transform_2, window_bounds = array<i64: 128, 128>}, {pipeline_mode = #tpu.pipeline_mode<synchronous>, transform_indices = @transform_3, window_bounds = array<i64: 1, 128>}, {pipeline_mode = #tpu.pipeline_mode<synchronous>, transform_indices = @transform_4, window_bounds = array<i64: 1, 128>}, {pipeline_mode = #tpu.pipeline_mode<synchronous>, transform_indices = @transform_5, window_bounds = array<i64: 8, 128>}]} {
    %c0_i32 = arith.constant 0 : i32
    %0 = arith.cmpi eq, %arg0, %c0_i32 : i32
    %1 = arith.extui %0 : i1 to i32
    %c0_i32_0 = arith.constant 0 : i32
    %2 = arith.cmpi ne, %1, %c0_i32_0 : i32
    scf.if %2 {
      %cst_8 = arith.constant 0.000000e+00 : f32
      %11 = vector.broadcast %cst_8 : f32 to vector<8x128xf32>
      %c0_9 = arith.constant 0 : index
      %c0_10 = arith.constant 0 : index
      %12 = vector.load %arg7[%c0_9, %c0_10] : memref<8x128xf32, #tpu.memory_space<vmem>>, vector<8x128xf32>
      tpu.vector_store %arg7[%c0_9, %c0_10], %11 {strides = array<i32>} : memref<8x128xf32, #tpu.memory_space<vmem>>, vector<8x128xf32>,
    } else {
    }
    %c0 = arith.constant 0 : index
    %c0_1 = arith.constant 0 : index
    %3 = vector.load %arg7[%c0, %c0_1] : memref<8x128xf32, #tpu.memory_space<vmem>>, vector<8x128xf32>
    %c0_2 = arith.constant 0 : index
    %c0_3 = arith.constant 0 : index
    %c0_4 = arith.constant 0 : index
    %4 = vector.load %arg2[%c0_2, %c0_3, %c0_4] : memref<8x8x128xf32, #tpu.memory_space<vmem>>, vector<8x8x128xf32>
    %cst = arith.constant dense<0.000000e+00> : vector<8x128xf32>
    %5 = vector.multi_reduction <add>, %4, %cst [1] : vector<8x8x128xf32> to vector<8x128xf32>
    %6 = arith.addf %3, %5 : vector<8x128xf32>
    %c0_5 = arith.constant 0 : index
    %c0_6 = arith.constant 0 : index
    %7 = vector.load %arg7[%c0_5, %c0_6] : memref<8x128xf32, #tpu.memory_space<vmem>>, vector<8x128xf32>
    tpu.vector_store %arg7[%c0_5, %c0_6], %6 {strides = array<i32>} : memref<8x128xf32, #tpu.memory_space<vmem>>, vector<8x128xf32>,
    %c3_i32 = arith.constant 3 : i32
    %8 = arith.cmpi eq, %arg0, %c3_i32 : i32
    %9 = arith.extui %8 : i1 to i32
    %c0_i32_7 = arith.constant 0 : i32
    %10 = arith.cmpi ne, %9, %c0_i32_7 : i32
    scf.if %10 {
      %c0_8 = arith.constant 0 : index
      %c0_9 = arith.constant 0 : index
      %11 = vector.load %arg1[%c0_8, %c0_9] : memref<8x32xf32, #tpu.memory_space<vmem>>, vector<8x32xf32>
      %cst_10 = arith.constant dense<0.000000e+00> : vector<8xf32>
      %12 = vector.multi_reduction <add>, %11, %cst_10 [1] : vector<8x32xf32> to vector<8xf32>
      %13 = vector.shape_cast %12 : vector<8xf32> to vector<8x1xf32>
      %c0_11 = arith.constant 0 : index
      %c0_12 = arith.constant 0 : index
      %14 = vector.load %arg7[%c0_11, %c0_12] : memref<8x128xf32, #tpu.memory_space<vmem>>, vector<8x128xf32>
      %15 = vector.broadcast %13 : vector<8x1xf32> to vector<8x128xf32>
      %16 = arith.divf %14, %15 : vector<8x128xf32>
      %c0_13 = arith.constant 0 : index
      %c0_14 = arith.constant 0 : index
      %17 = vector.load %arg3[%c0_13, %c0_14] : memref<128x128xf32, #tpu.memory_space<vmem>>, vector<128x128xf32>
      %cst_15 = arith.constant dense<0.000000e+00> : vector<8x128xf32>
      %18 = tpu.matmul %16, %17, %cst_15 {dimension_numbers = #tpu.dot_dimension_numbers<[1], [0], [0], [1], [0, 0, 1, 1], [], []>} : vector<8x128xf32>, vector<128x128xf32>, vector<8x128xf32> -> vector<8x128xf32>
      %cst_16 = arith.constant dense<0.000000e+00> : vector<128xf32>
      %19 = vector.multi_reduction <add>, %18, %cst_16 [0] : vector<8x128xf32> to vector<128xf32>
      %20 = vector.shape_cast %19 : vector<128xf32> to vector<1x128xf32>
      %cst_17 = arith.constant 8.000000e+00 : f32
      %21 = vector.broadcast %cst_17 : f32 to vector<1x128xf32>
      %22 = arith.divf %20, %21 : vector<1x128xf32>
      %23 = vector.broadcast %22 : vector<1x128xf32> to vector<8x128xf32>
      %24 = arith.subf %18, %23 : vector<8x128xf32>
      %25 = arith.mulf %24, %24 : vector<8x128xf32>
      %cst_18 = arith.constant dense<0.000000e+00> : vector<128xf32>
      %26 = vector.multi_reduction <add>, %25, %cst_18 [0] : vector<8x128xf32> to vector<128xf32>
      %27 = vector.shape_cast %26 : vector<128xf32> to vector<1x128xf32>
      %cst_19 = arith.constant 8.000000e+00 : f32
      %28 = vector.broadcast %cst_19 : f32 to vector<1x128xf32>
      %29 = arith.divf %27, %28 : vector<1x128xf32>
      %30 = vector.broadcast %22 : vector<1x128xf32> to vector<8x128xf32>
      %31 = arith.subf %18, %30 : vector<8x128xf32>
      %cst_20 = arith.constant 9.99999974E-6 : f32
      %32 = vector.broadcast %cst_20 : f32 to vector<1x128xf32>
      %33 = arith.addf %29, %32 : vector<1x128xf32>
      %34 = math.rsqrt %33 : vector<1x128xf32>
      %35 = vector.broadcast %34 : vector<1x128xf32> to vector<8x128xf32>
      %36 = arith.mulf %31, %35 : vector<8x128xf32>
      %c0_21 = arith.constant 0 : index
      %c0_22 = arith.constant 0 : index
      %37 = vector.load %arg4[%c0_21, %c0_22] : memref<1x128xf32, #tpu.memory_space<vmem>>, vector<1x128xf32>
      %38 = vector.broadcast %37 : vector<1x128xf32> to vector<8x128xf32>
      %39 = arith.mulf %36, %38 : vector<8x128xf32>
      %c0_23 = arith.constant 0 : index
      %c0_24 = arith.constant 0 : index
      %40 = vector.load %arg5[%c0_23, %c0_24] : memref<1x128xf32, #tpu.memory_space<vmem>>, vector<1x128xf32>
      %41 = vector.broadcast %40 : vector<1x128xf32> to vector<8x128xf32>
      %42 = arith.addf %39, %41 : vector<8x128xf32>
      %cst_25 = arith.constant 0.000000e+00 : f32
      %43 = vector.broadcast %cst_25 : f32 to vector<8x128xf32>
      %44 = arith.maximumf %42, %43 : vector<8x128xf32>
      %c0_26 = arith.constant 0 : index
      %c0_27 = arith.constant 0 : index
      %45 = vector.load %arg6[%c0_26, %c0_27] : memref<8x128xf32, #tpu.memory_space<vmem>>, vector<8x128xf32>
      tpu.vector_store %arg6[%c0_26, %c0_27], %44 {strides = array<i32>} : memref<8x128xf32, #tpu.memory_space<vmem>>, vector<8x128xf32>,
    } else {
    }
    return
  }
  func.func @transform_0(%arg0: i32) -> (i32, i32) {
    %c0_i32 = arith.constant 0 : i32
    %c0_i32_0 = arith.constant 0 : i32
    %c0_i32_1 = arith.constant 0 : i32
    return %c0_i32, %c0_i32_0 : i32, i32
  }
  func.func @transform_1(%arg0: i32) -> (i32, i32, i32) {
    %c0_i32 = arith.constant 0 : i32
    %c0_i32_0 = arith.constant 0 : i32
    %c0_i32_1 = arith.constant 0 : i32
    return %c0_i32, %arg0, %c0_i32_0 : i32, i32, i32
  }
  func.func @transform_2(%arg0: i32) -> (i32, i32) {
    %c0_i32 = arith.constant 0 : i32
    %c0_i32_0 = arith.constant 0 : i32
    %c0_i32_1 = arith.constant 0 : i32
    return %c0_i32, %c0_i32_0 : i32, i32
  }
  func.func @transform_3(%arg0: i32) -> (i32, i32) {
    %c0_i32 = arith.constant 0 : i32
    %c0_i32_0 = arith.constant 0 : i32
    %c0_i32_1 = arith.constant 0 : i32
    return %c0_i32, %c0_i32_0 : i32, i32
  }
  func.func @transform_4(%arg0: i32) -> (i32, i32) {
    %c0_i32 = arith.constant 0 : i32
    %c0_i32_0 = arith.constant 0 : i32
    %c0_i32_1 = arith.constant 0 : i32
    return %c0_i32, %c0_i32_0 : i32, i32
  }
  func.func @transform_5(%arg0: i32) -> (i32, i32) {
    %c0_i32 = arith.constant 0 : i32
    %c0_i32_0 = arith.constant 0 : i32
    %c0_i32_1 = arith.constant 0 : i32
    return %c0_i32, %c0_i32_0 : i32, i32
  }
}

</mosaic_0001>

<bundles_post_ra>
// kernel: tpu_custom_call.1
= control target key start
LH: loop header
LB: loop body
LE: loop exit
PB: predicated region body
PF: predicated region fallthrough
CT: control target
= control target key end

     0   :  { %10 = vsyncpa [#allocation4], 0  ;;  %s1150_s0 = inlined_call_operand.hbm [shape: f32[8,32], index: 0, kind: input, shape index: {}]   ;;  %s1151_s1 = inlined_call_operand.hbm [shape: f32[8,32,128], index: 1, kind: input, shape index: {}]   ;;  %s1152_s2 = inlined_call_operand.hbm [shape: f32[128,128], index: 2, kind: input, shape index: {}]   ;;  %s1153_s3 = inlined_call_operand.vmem [shape: f32[1,128], index: 3, kind: input, shape index: {}]   ;;  %s1154_s4 = inlined_call_operand.vmem [shape: f32[1,128], index: 4, kind: input, shape index: {}]   ;;  %s1155_s5 = inlined_call_operand.hbm [shape: f32[8,128], index: 5, kind: output, shape index: {}]  }
   0x1   :  { %11 = vsyncpa [#allocation7], 0 }
   0x2   :  { %13 = vsyncpa [#allocation7 + $0x1], 0 }
   0x3   :  { %14 = vsyncpa [#allocation5], 0  ;;  %s932_s18 = smov 0   ;;  %s934_s19 = smov 0  }
   0x4   :  { %s936_s20 = smov 0   ;;  %s938_s21 = smov 0  }
   0x5 LB: > { %s951_s22 = sadd.s32 4294967295, %s889_s21   ;;  %s954_s23 = sadd.s32 1, %s889_s21   ;;  %s889_s21 = sphi %s938_s21, %s1176_s21   ;;  %s885_s20 = sphi %s936_s20, %s1175_s20   ;;  %s881_s19 = sphi %s934_s19, %s1174_s19   ;;  %s877_s18 = sphi %s932_s18, %s1173_s18  }
   0x6   : > { %s45_s24 = ssub.s32 %s889_s21, %s954_s23  ;;  %s48_s25 = sadd.s32 1, %s885_s20 }
   0x7   : > { %p46_p0 = scmp.eq.s32.totalorder %s45_s24, 0  ;;  %p55_p1 = scmp.ne.s32.totalorder %s885_s20, %s881_s19 }
   0x8   : > { %p56_p2 = scmp.eq.s32.totalorder %s889_s21, 0  ;;  %p61_p3 = scmp.ne.s32.totalorder %s881_s19, %s877_s18 }
   0x9   : > { %s964_s26 = scalar_select %p46_p0, %s885_s20, %s48_s25  }
   0xa   : > { %p966_p4 = por %p56_p2, %p55_p1  ;;  %p1156_p5 = scmp.eq.s32.totalorder %s951_s22, 0 }
   0xb   : > { %p559_p6 = scmp.ge.s32.totalorder %s889_s21, 1  ;;  %p156_p7 = scmp.lt.s32.totalorder %s889_s21, 5 }
   0xc   : > { %p975_p8 = por %p1156_p5, %p61_p3  ;;  %s891_s30 = smov [#allocation8]  }
   0xd   : > { %p980_p10 = pnand %p559_p6, %p156_p7  ;;  %s179_s6 = sshll.u32 %s891_s30, 4  ;;  %s180_s6 = int_to_ptr.vmem [resolvable:$true] %s179_s6 }
   0xe   : > { %s1161_s28 = scalar_select %p975_p8, 1, 0 }
   0xf   : > { %s1162_s29 = scalar_select %p980_p10, 1, 0 }
  0x10   : > { %p667_p11 = pneg %p980_p10  ;;  %p680_p13 = scmp.lt.s32.totalorder %s889_s21, 4 }
  0x11   : > { %s199_s8 = sand.u32 1, %s889_s21   ;;  %s731_s12 = scalar_lea.hbm %s1152_s2, 2048 }
  0x12   : > { %p988_p12 = pnand %p667_p11, %p1156_p5  ;;  %p996_p0 = pnand %p680_p13, %p966_p4 }
  0x13   : > { %p732_p1 = scmp.ne.s32.totalorder %s1152_s2, %s731_s12  ;;  %p738_p4 = scmp.lt.u32.totalorder %s731_s12, %s1152_s2 }
  0x14   : > { %s1164_s9 = scalar_select %p996_p0, 1, 0 }
  0x15   : > { %p733_p2 = pneg %p988_p12 }
  0x17   : > { %p734_p3 = pnand %p733_p2, %p732_p1 }
  0x19   : > { %p735_p6 = pneg %p734_p3 }
  0x1b   : > { %p740_p7 = pnand %p738_p4, %p735_p6 }
  0x1d   : > { %743 = shalt.err (!%p740_p7)
}
  0x1e   : > { %s744_s17 = scalar_lea.vmem %s180_s6, 2048  ;;  %p752_p5 = scmp.lt.s32.totalorder %s180_s6, %s180_s6 }
  0x1f   : > { %p745_p11 = scmp.ne.s32.totalorder %s180_s6, %s744_s17  ;;  %p753_p8 = scmp.lt.s32.totalorder %s744_s17, %s744_s17 }
  0x21   : > { %p747_p13 = pnand %p745_p11, %p733_p2  ;;  %p754_p10 = por %p753_p8, %p752_p5 }
  0x23   : > { %p748_p9 = pneg %p747_p13 }
  0x25   : > { %p755_p0 = pnand %p754_p10, %p748_p9 }
  0x27   : > { %758 = shalt.err (!%p755_p0)
}
  0x28   : > { %s892_s18 = smov 128   ;;  %s893_s24 = smov 8  }
  0x29   : > { %673 = dma.hbm_to_vmem [thread:$0]  (!%p988_p12), %s1152_s2, 2048, %s180_s6, [#allocation7], %s892_s18, %s892_s18, %s893_s24  }
  0x2a   : > { %s894_s30 = smov [#allocation3]   ;;  %s759_s13 = scalar_lea.hbm %s1150_s0, 128 }
  0x2b   : > { %s169_s10 = sshll.u32 %s894_s30, 4  ;;  %p760_p5 = scmp.ne.s32.totalorder %s1150_s0, %s759_s13  ;;  %s170_s10 = int_to_ptr.vmem [resolvable:$true] %s169_s10 }
  0x2c   : > { %p766_p10 = scmp.lt.u32.totalorder %s759_s13, %s1150_s0 }
  0x2d   : > { %p762_p8 = pnand %p760_p5, %p733_p2 }
  0x2f   : > { %p763_p9 = pneg %p762_p8 }
  0x31   : > { %p768_p0 = pnand %p766_p10, %p763_p9 }
  0x33   : > { %771 = shalt.err (!%p768_p0)
}
  0x34   : > { %s772_s6 = scalar_lea.vmem %s170_s10, 128  ;;  %p780_p4 = scmp.lt.s32.totalorder %s170_s10, %s170_s10 }
  0x35   : > { %p773_p1 = scmp.ne.s32.totalorder %s170_s10, %s772_s6  ;;  %p781_p7 = scmp.lt.s32.totalorder %s772_s6, %s772_s6 }
  0x37   : > { %p775_p3 = pnand %p773_p1, %p733_p2  ;;  %p782_p11 = por %p781_p7, %p780_p4 }
  0x39   : > { %p776_p6 = pneg %p775_p3 }
  0x3b   : > { %p783_p13 = pnand %p782_p11, %p776_p6 }
  0x3d   : > { %786 = shalt.err (!%p783_p13)
}
  0x3e   : > { %670 = dma.hbm_to_vmem [thread:$0]  (!%p988_p12), %s1150_s0, 128, %s170_s10, [#allocation4]  }
  0x3f   : > { %s201_s30 = sand.u32 1, %s885_s20   ;;  %s564_s11 = sshll.u32 %s889_s21, 7 }
  0x40   : > { %s563_s12 = sshll.u32 %s201_s30, 6  ;;  %s1050_s15 = scalar_lea.hbm %s1151_s1, %s564_s11 }
  0x41   : > { %s203_s7 = scalar_lea.vmem [#allocation6], %s563_s12  ;;  %s1056_s17 = scalar_lea.sflag [#allocation7], %s199_s8 }
  0x42   : > { %s209_s16 = sshll.u32 %s203_s7, 4  ;;  %s787_s10 = scalar_lea.hbm %s1050_s15, 1024  ;;  %s1052_s16 = int_to_ptr.vmem [resolvable:$true] %s209_s16 }
  0x43   : > { %p788_p12 = scmp.ne.s32.totalorder %s1050_s15, %s787_s10  ;;  %p1165_p2 = scmp.ne.s32.totalorder %s1164_s9, 0 }
  0x44   : > { %s792_s27 = scalar_lea.hbm %s1151_s1, 4096  ;;  %p793_p10 = scmp.lt.u32.totalorder %s1050_s15, %s1151_s1 }
  0x45   : > { %p789_p5 = pneg %p1165_p2  ;;  %p794_p0 = scmp.lt.u32.totalorder %s792_s27, %s787_s10 }
  0x46   : > { %p796_p3 = scmp.lt.u32.totalorder %s787_s10, %s1050_s15 }
  0x47   : > { %p790_p8 = pnand %p789_p5, %p788_p12  ;;  %p795_p1 = por %p794_p0, %p793_p10 }
  0x49   : > { %p791_p9 = pneg %p790_p8  ;;  %p797_p6 = por %p796_p3, %p795_p1 }
  0x4b   : > { %p798_p4 = pnand %p797_p6, %p791_p9 }
  0x4d   : > { %801 = shalt.err (!%p798_p4)
}
  0x4e   : > { %s802_s21 = scalar_lea.vmem %s1052_s16, 1024  ;;  %s895_s8 = smov [#allocation6]  }
  0x4f   : > { %p803_p7 = scmp.ne.s32.totalorder %s1052_s16, %s802_s21  ;;  %s807_s12 = sshll.u32 %s895_s8, 4  ;;  %s808_s12 = int_to_ptr.vmem [resolvable:$false] %s807_s12 }
  0x50   : > { %s809_s13 = scalar_lea.vmem %s808_s12, 2048  ;;  %p810_p12 = scmp.lt.s32.totalorder %s1052_s16, %s808_s12 }
  0x51   : > { %p805_p11 = pnand %p803_p7, %p789_p5  ;;  %p811_p8 = scmp.lt.s32.totalorder %s809_s13, %s802_s21 }
  0x53   : > { %p806_p13 = pneg %p805_p11  ;;  %p812_p10 = por %p811_p8, %p810_p12 }
  0x55   : > { %p813_p0 = pnand %p812_p10, %p806_p13 }
  0x57   : > { %816 = shalt.err (!%p813_p0)
}
  0x58   : > { %s896_s14 = smov 512   ;;  %p1166_p5 = scmp.ne.s32.totalorder %s1162_s29, 0 }
  0x59   : > { %677 = dma.hbm_to_vmem [thread:$0]  (!%p1165_p2), %s1050_s15, 1024, %s1052_s16, %s1056_s17, %s896_s14, %s892_s18, %s893_s24  }
  0x5a   : > { %221 = sbr.rel (%p1166_p5) target bundleno = 577 (0x241), region = 40  ;;  %p1167_p9 = scmp.eq.s32.totalorder (!%p1166_p5), %s951_s22, 0 }
  0x61   : > { %860 = dma.done.wait (%p1167_p9), [#allocation4], 128   ;;  %p1168_p1 = pmov %p1167_p9 }
  0x62   : > { %s227_s7 = sand.u32 1, %s951_s22   ;;  %s229_s9 = sand.u32 1, %s881_s19  }
  0x63   : > { %862 = vsyncadd (%p1168_p1), [#allocation4], 4294967168  ;;  %s567_s10 = sshll.u32 %s229_s9, 6  ;;  %s228_s6 = scalar_lea.sflag [#allocation7], %s227_s7 }
  0x64   : > { %s231_s25 = scalar_lea.vmem [#allocation6], %s567_s10  ;;  %p1169_p3 = scmp.ne.s32.totalorder %s1161_s28, 0 }
  0x66   : > { %864 = dma.done.wait (%p1169_p3), %s228_s6, 1024  }
  0x67   : > { %866 = vsyncadd (%p1169_p3), %s228_s6, 4294966272  ;;  %p1170_p2 = pmov %p1168_p1 }
  0x68   : > { %p1171_p6 = pmov %p1168_p1 }
  0x69   : > { %868 = dma.done.wait (%p1170_p2), [#allocation7], 2048  }
  0x6a   : > { %870 = vsyncadd (%p1171_p6), [#allocation7], 4294965248  ;;  %p1172_p4 = scmp.ne.s32.totalorder %s951_s22, 0 }
  0x6b   : > { %v897_v0 = vmov (!%p1172_p4), 0.0  }
  0x6c   : > { %260 = sbr.rel (%p1172_p4) target bundleno = 115 (0x73), region = 56  ;;  %261 = vst [vmem:[#allocation2] sm:$0xff] (!%p1172_p4), %v897_v0 }
  0x73 PF: > { %v263_v1 = vld [vmem:[%s231_s25] sm:$0xff]  ;;  %v264_v2 = vld [vmem:[%s231_s25 + $0x8] sm:$0xff]  ;;  %v265_v3 = vld [vmem:[%s231_s25 + $0x10] sm:$0xff]  ;;  %vm327_vm0 = vcmask 1041409   ;;  %vm329_vm1 = vcmask 1042434   ;;  %vm331_vm2 = vcmask 1043459  }
  0x74   : > { %v266_v4 = vld [vmem:[%s231_s25 + $0x18] sm:$0xff]  ;;  %v267_v5 = vld [vmem:[%s231_s25 + $0x20] sm:$0xff]  ;;  %v271_v6 = vrot.slane %v263_v1, 4  ;;  %v277_v7 = vrot.slane %v264_v2, 4  ;;  %v268_v8 = vld [vmem:[%s231_s25 + $0x28] sm:$0xff]  ;;  %v283_v11 = vrot.slane %v265_v3, 4 }
  0x75   : > { %v269_v9 = vld [vmem:[%s231_s25 + $0x30] sm:$0xff]  ;;  %v270_v10 = vld [vmem:[%s231_s25 + $0x38] sm:$0xff]  ;;  %v289_v12 = vrot.slane %v266_v4, 4  ;;  %v295_v13 = vrot.slane %v267_v5, 4  ;;  %v301_v16 = vrot.slane %v268_v8, 4  ;;  %vm333_vm3 = vcmask 1044484  }
  0x76   : > { %v272_v14 = vadd.f32 %v271_v6, %v263_v1  ;;  %v278_v15 = vadd.f32 %v277_v7, %v264_v2  ;;  %v307_v17 = vrot.slane %v269_v9, 4  ;;  %v284_v18 = vadd.f32 %v283_v11, %v265_v3  ;;  %v262_v61 = vld [vmem:[#allocation2] sm:$0xff]  ;;  %p570_p7 = scmp.ne.s32.totalorder %s951_s22, 3 }
  0x77   : > { %v290_v19 = vadd.f32 %v289_v12, %v266_v4  ;;  %v296_v20 = vadd.f32 %v295_v13, %v267_v5  ;;  %v313_v21 = vrot.slane %v270_v10, 4  ;;  %v302_v24 = vadd.f32 %v301_v16, %v268_v8  ;;  %v348_v2 = vld [vmem:[#allocation3] sm:$0xff] (!%p570_p7)  ;;  %v356_v3 = vld [vmem:[#allocation8] sm:$0xff] (!%p570_p7)  ;;  %v357_v4 = vld [vmem:[#allocation8 + $0x8] sm:$0xff] (!%p570_p7) }
  0x78   : > { %v273_v22 = vrot.slane %v272_v14, 2  ;;  %v279_v23 = vrot.slane %v278_v15, 2  ;;  %v308_v25 = vadd.f32 %v307_v17, %v269_v9  ;;  %v285_v26 = vrot.slane %v284_v18, 2  ;;  %v358_v8 = vld [vmem:[#allocation8 + $0x10] sm:$0xff] (!%p570_p7)  ;;  %v359_v9 = vld [vmem:[#allocation8 + $0x18] sm:$0xff] (!%p570_p7)  ;;  %v360_v11 = vld [vmem:[#allocation8 + $0x20] sm:$0xff] (!%p570_p7) }
  0x79   : > { %v291_v27 = vrot.slane %v290_v19, 2  ;;  %v297_v28 = vrot.slane %v296_v20, 2  ;;  %v314_v29 = vadd.f32 %v313_v21, %v270_v10  ;;  %v303_v32 = vrot.slane %v302_v24, 2  ;;  %v361_v12 = vld [vmem:[#allocation8 + $0x28] sm:$0xff] (!%p570_p7)  ;;  %v364_v17 = vld [vmem:[#allocation8 + $0x40] sm:$0xff] (!%p570_p7)  ;;  %v367_v21 = vld [vmem:[#allocation8 + $0x58] sm:$0xff] (!%p570_p7) }
  0x7a   : > { %v274_v30 = vadd.f32 %v273_v22, %v272_v14  ;;  %v280_v31 = vadd.f32 %v279_v23, %v278_v15  ;;  %v309_v33 = vrot.slane %v308_v25, 2  ;;  %v286_v34 = vadd.f32 %v285_v26, %v284_v18  ;;  %v362_v14 = vld [vmem:[#allocation8 + $0x30] sm:$0xff] (!%p570_p7)  ;;  %v363_v15 = vld [vmem:[#allocation8 + $0x38] sm:$0xff] (!%p570_p7)  ;;  %v365_v18 = vld [vmem:[#allocation8 + $0x48] sm:$0xff] (!%p570_p7) }
  0x7b   : > { %v292_v35 = vadd.f32 %v291_v27, %v290_v19  ;;  %v298_v36 = vadd.f32 %v297_v28, %v296_v20  ;;  %v315_v37 = vrot.slane %v314_v29, 2  ;;  %v304_v40 = vadd.f32 %v303_v32, %v302_v24  ;;  %v366_v20 = vld [vmem:[#allocation8 + $0x50] sm:$0xff] (!%p570_p7)  ;;  %v368_v24 = vld [vmem:[#allocation8 + $0x60] sm:$0xff] (!%p570_p7)  ;;  %v371_v28 = vld [vmem:[#allocation8 + $0x78] sm:$0xff] (!%p570_p7) }
  0x7c   : > { %v275_v38 = vrot.slane %v274_v30, 1  ;;  %v281_v39 = vrot.slane %v280_v31, 1  ;;  %v310_v41 = vadd.f32 %v309_v33, %v308_v25  ;;  %v287_v42 = vrot.slane %v286_v34, 1  ;;  %v369_v25 = vld [vmem:[#allocation8 + $0x68] sm:$0xff] (!%p570_p7)  ;;  %v370_v27 = vld [vmem:[#allocation8 + $0x70] sm:$0xff] (!%p570_p7) }
  0x7d   : > { %v293_v43 = vrot.slane %v292_v35, 1  ;;  %v299_v44 = vrot.slane %v298_v36, 1  ;;  %v316_v45 = vadd.f32 %v315_v37, %v314_v29  ;;  %v305_v48 = vrot.slane %v304_v40, 1 }
  0x7e   : > { %v276_v46 = vadd.f32 %v275_v38, %v274_v30  ;;  %v282_v47 = vadd.f32 %v281_v39, %v280_v31  ;;  %v311_v49 = vrot.slane %v310_v41, 1  ;;  %v288_v50 = vadd.f32 %v287_v42, %v286_v34 }
  0x7f   : > { %v294_v51 = vadd.f32 %v293_v43, %v292_v35  ;;  %v300_v52 = vadd.f32 %v299_v44, %v298_v36  ;;  %v317_v53 = vrot.slane %v316_v45, 1  ;;  %v306_v54 = vadd.f32 %v305_v48, %v304_v40 }
  0x80   : > { %v328_v55 = vsel %vm327_vm0, %v282_v47, %v276_v46  ;;  %v312_v56 = vadd.f32 %v311_v49, %v310_v41  ;;  %vm335_vm4 = vcmask 1045509   ;;  %vm337_vm5 = vcmask 1046534  }
  0x81   : > { %v330_v57 = vsel %vm329_vm1, %v288_v50, %v328_v55  ;;  %v318_v58 = vadd.f32 %v317_v53, %v316_v45  ;;  %vm339_vm6 = vcmask 1047559   ;;  %vm349_vm7 = vcmask (!%p570_p7), 261120  }
  0x82   : > { %v332_v59 = vsel %vm331_vm2, %v294_v51, %v330_v57  ;;  %v350_v5 = vsel (!%p570_p7), %vm349_vm7, %v348_v2, 0.0  ;;  %v898_v6 = vmov (!%p570_p7), 0.0|0.0   ;;  %v630_v7 = vpack.c.bf16 (!%p570_p7), %v357_v4, %v356_v3 }
  0x83   : > { %v334_v60 = vsel %vm333_vm3, %v300_v52, %v332_v59  ;;  %347 = sbr.rel (%p570_p7) target bundleno = 552 (0x228), region = 60  ;;  %629 = vmatprep.subr.bf16.mxu0 (!%p570_p7), %v898_v6  ;;  %351 = vadd.xlane.f32.xlu0 (!%p570_p7), %v350_v5  ;;  %v633_v10 = vpack.c.bf16 (!%p570_p7), %v359_v9, %v358_v8  ;;  %v636_v13 = vpack.c.bf16 (!%p570_p7), %v361_v12, %v360_v11  ;;  %vm899_vm8 = vmmov (!%p570_p7), 0  }
  0x84   : > { %v336_v62 = vsel %vm335_vm4, %v306_v54, %v334_v60  ;;  %631 = vmatpush3.bf16.msra.mxu0 (!%p570_p7), %v630_v7  ;;  %v639_v16 = vpack.c.bf16 (!%p570_p7), %v363_v15, %v362_v14  ;;  %v642_v19 = vpack.c.bf16 (!%p570_p7), %v365_v18, %v364_v17  ;;  %v900_v22 = vmov (!%p570_p7), 0.0   ;;  %v571_v54 = vld [vmem:[%s1153_s3] ss:$0 sm:$0xff] (!%p570_p7) }
  0x85   : > { %v338_v63 = vsel %vm337_vm5, %v312_v56, %v336_v62  ;;  %632 = vmatprep.subr.bf16.mxu0 (!%p570_p7), %v898_v6  ;;  %626 = vmatprep.mubr.msk.f32.mxu0 (!%p570_p7), %vm899_vm8, %v900_v22  ;;  %v645_v23 = vpack.c.bf16 (!%p570_p7), %v367_v21, %v366_v20  ;;  %v648_v26 = vpack.c.bf16 (!%p570_p7), %v369_v25, %v368_v24  ;;  %v572_v56 = vld [vmem:[%s1154_s4] ss:$0 sm:$0xff] (!%p570_p7) }
  0x86   : > { %v340_v0 = vsel %vm339_vm6, %v318_v58, %v338_v63  ;;  %v651_v29 = vpack.c.bf16 (!%p570_p7), %v371_v28, %v370_v27 }
  0x87   : > { %v342_v1 = vadd.f32 %v340_v0, %v262_v61 }
  0x88   : > { %634 = vmatpush3.bf16.msra.mxu0 (!%p570_p7), %v633_v10 }
  0x89   : > { %343 = vst [vmem:[#allocation2] sm:$0xff] %v342_v1  ;;  %635 = vmatprep.subr.bf16.mxu0 (!%p570_p7), %v898_v6 }
  0x8c   : > { %637 = vmatpush3.bf16.msra.mxu0 %v636_v13 }
  0x8d   : > { %638 = vmatprep.subr.bf16.mxu0 %v898_v6 }
  0x90   : > { %640 = vmatpush3.bf16.msra.mxu0 %v639_v16  ;;  %v353_v31 = vld [vmem:[#allocation2] sm:$0xff] }
  0x91   : > { %641 = vmatprep.subr.bf16.mxu0 %v898_v6 }
  0x94   : > { %643 = vmatpush3.bf16.msra.mxu0 %v642_v19 }
  0x95   : > { %644 = vmatprep.subr.bf16.mxu0 %v898_v6 }
  0x98   : > { %646 = vmatpush3.bf16.msra.mxu0 %v645_v23 }
  0x99   : > { %647 = vmatprep.subr.bf16.mxu0 %v898_v6 }
  0x9c   : > { %649 = vmatpush3.bf16.msra.mxu0 %v648_v26 }
  0x9d   : > { %650 = vmatprep.subr.bf16.mxu0 %v898_v6 }
  0xa0   : > { %652 = vmatpush3.bf16.msra.mxu0 %v651_v29 }
 0x110   : > { %v352_v30 = vpop.xlane.xlu0 %351 }
 0x111   : > { %727 = vrcp.f32 %v352_v30 }
 0x11b   : > { %v728_v32 = vpop.eup %727 }
 0x11c   : > { %v355_v33 = vmul.f32 %v728_v32, %v353_v31 }
 0x11e   : > { %627 = vmatmul.mubr.f32.vlgmr.msra.gmra.mrb[0].mxu0 %v355_v33 }
 0x1f1   : > { %v438_v34 = vpop.f32.mrb[0].mxu0 }
 0x1f2   : > { %v442_v35 = vrot.slane %v438_v34, 4  ;;  %v628_v36 = vpop.f32.mrb[1].mxu0 }
 0x1f4   : > { %v443_v37 = vadd.f32 %v442_v35, %v438_v34 }
 0x1f6   : > { %v444_v38 = vrot.slane %v443_v37, 2 }
 0x1f8   : > { %v445_v39 = vadd.f32 %v444_v38, %v443_v37 }
 0x1fa   : > { %v446_v40 = vrot.slane %v445_v39, 1 }
 0x1fc   : > { %v447_v41 = vadd.f32 %v446_v40, %v445_v39 }
 0x1fe   : > { %v449_v42 = vmul.f32 0.125, %v447_v41 }
 0x200   : > { %v450_v43 = vsub.f32 %v438_v34, %v449_v42 }
 0x202   : > { %v451_v44 = vmul.f32 %v450_v43, %v450_v43 }
 0x204   : > { %v452_v45 = vrot.slane %v451_v44, 4 }
 0x206   : > { %v453_v46 = vadd.f32 %v452_v45, %v451_v44 }
 0x208   : > { %v454_v47 = vrot.slane %v453_v46, 2 }
 0x20a   : > { %v455_v48 = vadd.f32 %v454_v47, %v453_v46 }
 0x20c   : > { %v456_v49 = vrot.slane %v455_v48, 1 }
 0x20e   : > { %v457_v50 = vadd.f32 %v456_v49, %v455_v48 }
 0x210   : > { %v458_v51 = vmul.f32 0.125, %v457_v50 }
 0x212   : > { %v459_v52 = vadd.f32 1e-05, %v458_v51 }
 0x214   : > { %729 = vrsqrt.f32 %v459_v52 }
 0x21e   : > { %v730_v53 = vpop.eup %729 }
 0x21f   : > { %v461_v55 = vmul.f32 %v730_v53, %v450_v43 }
 0x221   : > { %v469_v57 = vmul.f32 %v571_v54, %v461_v55 }
 0x223   : > { %v477_v58 = vadd.f32 %v572_v56, %v469_v57 }
 0x225   : > { %v478_v59 = vmax.f32 %v477_v58, 0.0 }
 0x227   : > { %479 = vst [vmem:[#allocation9] sm:$0xff] %v478_v59 }
 0x228 PF: > { %p683_p11 = scmp.eq.s32.totalorder %s951_s22, 3  ;;  %s901_s15 = smov [#allocation9]  }
 0x229   : > { %s487_s16 = sshll.u32 %s901_s15, 4  ;;  %s488_s16 = int_to_ptr.vmem [resolvable:$true] %s487_s16 }
 0x22a   : > { %s817_s17 = scalar_lea.vmem %s488_s16, 128  ;;  %p824_p10 = scmp.lt.s32.totalorder %s488_s16, %s488_s16 }
 0x22b   : > { %p818_p13 = scmp.ne.s32.totalorder %s488_s16, %s817_s17  ;;  %p825_p0 = scmp.lt.s32.totalorder %s817_s17, %s817_s17 }
 0x22d   : > { %p819_p12 = pnand %p818_p13, %p683_p11  ;;  %p826_p5 = por %p825_p0, %p824_p10 }
 0x22f   : > { %p820_p8 = pneg %p819_p12 }
 0x231   : > { %p827_p9 = pnand %p826_p5, %p820_p8 }
 0x233   : > { %830 = shalt.err (!%p827_p9)
}
 0x234   : > { %s831_s11 = scalar_lea.hbm %s1155_s5, 128 }
 0x235   : > { %p832_p1 = scmp.ne.s32.totalorder %s1155_s5, %s831_s11  ;;  %p837_p6 = scmp.lt.u32.totalorder %s831_s11, %s1155_s5 }
 0x237   : > { %p833_p3 = pnand %p832_p1, %p683_p11 }
 0x239   : > { %p834_p2 = pneg %p833_p3 }
 0x23b   : > { %p839_p4 = pnand %p837_p6, %p834_p2 }
 0x23d   : > { %842 = shalt.err (!%p839_p4)
}
 0x23e   : > { %664 = dma.vmem_to_hbm [thread:$0]  (%p683_p11), %s488_s16, 128, %s1155_s5, [#allocation5]  }
 0x23f   : > { %872 = dma.done.wait (%p683_p11), [#allocation5], 128  }
 0x240   : > { %874 = vsyncadd (%p683_p11), [#allocation5], 4294967168 }
 0x241 PF: > { %p17_p7 = scmp.ge.s32.totalorder %s954_s23, 6   ;;  %s1173_s18 = smov %s881_s19 }
 0x242   : > { %s1174_s19 = smov %s885_s20  ;;  %s1175_s20 = smov %s964_s26 }
 0x243   : > { %s1176_s21 = smov %s954_s23  ;;  %19 = sbr.rel (!%p17_p7) target bundleno = 5 (0x5), region = 94 }
 0x24a   :  { %500 = vsyncpa [#allocation4], 1 }
 0x24b   :  { %502 = vsyncpa [#allocation4 + $0x1], 1 }
 0x24c   :  { %503 = vsyncpa [#allocation7], 1 }
 0x24d   :  { %505 = vsyncpa [#allocation7 + $0x1], 1 }
 0x24e   :  { %506 = vsyncpa [#allocation5], 1 }
 0x24f   :  { %508 = vsyncpa [#allocation5 + $0x1], 1 }

</bundles_post_ra>
